<compile_context>
chip_gen: v6e
topology: v6e:2x2x1
jax: 0.10.0
libtpu: 0.0.40
codegen_flags: <defaults>
</compile_context>

<pallas_src>
import math

import numpy as np
import jax
import jax.numpy as jnp
from jax.experimental import pallas as pl
from jax.experimental.pallas import tpu as pltpu


def _gaussian_1d_factors(kernel_size, sigma, dim=2):
    """1-D factors of the PyTorch module's (separable) Gaussian weight.

    Reproduces the module's formula exactly, including its non-standard
    exp(-((t - mean) / (2*sigma))**2) term.  The module's normalized 2-D
    kernel equals the outer product of these normalized 1-D kernels.
    """
    if isinstance(kernel_size, (int, float)):
        kernel_size = [int(kernel_size)] * dim
    if isinstance(sigma, (int, float)):
        sigma = [float(sigma)] * dim
    factors = []
    for size, std in zip(kernel_size, sigma):
        mean = (size - 1) / 2.0
        t = np.arange(size, dtype=np.float64)
        f = (1.0 / (std * math.sqrt(2.0 * math.pi))) * np.exp(
            -(((t - mean) / (2.0 * std)) ** 2))
        factors.append(f / f.sum())
    return factors


def _separable_pass(arr, weights, step):
    """One 1-D conv pass along the flattened lane axis.

    out[:, f] = sum_i w[i] * arr[:, f + i*step]; taps realized as static XLU
    lane rolls, symmetric taps paired (ceil(K/2) VALU multiplies per pass).
    Wrap-around garbage only reaches the trailing (K-1)*step lane positions of
    each plane row, i.e. exactly the rows/cols a valid conv discards.
    """
    K = len(weights)
    L = arr.shape[-1]

    def tap(i):
        s = (i * step) % L
        return arr if s == 0 else pltpu.roll(arr, shift=(L - s) % L, axis=1)

    acc = None
    i = 0
    while i < K - 1 - i:
        j = K - 1 - i
        if weights[i] == weights[j]:          # Gaussian symmetry: pair taps
            term = weights[i] * (tap(i) + tap(j))
        else:
            term = weights[i] * tap(i) + weights[j] * tap(j)
        acc = term if acc is None else acc + term
        i += 1
    if i == K - 1 - i:                        # middle tap (odd K)
        term = weights[i] * tap(i)
        acc = term if acc is None else acc + term
    return acc


def gaussian_smoothing(x, kernel_size, sigma):
    """Depthwise valid Gaussian conv2d.  x: (N, C, H, W) -> (N, C, Ho, Wo)."""
    # TODO(synk): dim=1 / dim=3 variants of the module are not implemented
    # (only the default dim=2 spatial case).
    gh, gw = _gaussian_1d_factors(kernel_size, sigma, dim=2)
    Kh, Kw = len(gh), len(gw)
    N, C, H, W = x.shape
    Ho, Wo = H - Kh + 1, W - Kw + 1
    assert Ho > 0 and Wo > 0, "kernel larger than input"

    ghf = tuple(float(v) for v in gh)    # baked-in constants (no SMEM ref)
    gwf = tuple(float(v) for v in gw)

    # ---- layout: (N,C,H,W) -> (P, H*W); planes on sublanes, spatial on lanes.
    # Pure reshape (no transpose); unpack below is reshape + slice.
    P, HW = N * C, H * W
    x_flat = x.reshape(P, HW)

    # ---- plane (sublane) tiling -------------------------------------------
    # ~2 MiB input blocks (near the measured HBM-roofline sweet spot), tile a
    # multiple of 8 sublanes dividing the padded plane count, and >= 2 grid
    # steps whenever there are enough planes so v7x's second core has work.
    BLOCK_BYTES = 2 << 20
    P8 = max(8, ((P + 7) // 8) * 8)
    m = P8 // 8
    rows_budget = max(8, ((BLOCK_BYTES // (HW * 4)) // 8) * 8)
    cap = min(rows_budget, P8 // 2) if P8 >= 16 else min(rows_budget, P8)
    cap = max(cap, 8)
    tile_P = 8
    for d in range(1, m + 1):                 # largest mult-of-8 divisor of P8
        if m % d == 0 and 8 * d <= cap:       # within the byte budget
            tile_P = 8 * d
    P_pad = P8                                # tile_P divides P_pad by design
    if P_pad != P:
        x_flat = jnp.pad(x_flat, ((0, P_pad - P), (0, 0)))
    grid = (P_pad // tile_P,)
    # TODO(synk): for very large H*W even a single (8, H*W) block can exceed
    # VMEM; that case needs an H-tiled grid with a (Kh-1)-row halo.

    def kernel(x_ref, o_ref):
        xf = x_ref[...].astype(jnp.float32)
        tmp = _separable_pass(xf, ghf, W)     # vertical: lane rolls by i*W
        acc = _separable_pass(tmp, gwf, 1)    # horizontal: lane rolls by j
        o_ref[...] = acc.astype(o_ref.dtype)

    itemsize = int(jnp.dtype(x.dtype).itemsize)
    cost = pl.CostEstimate(
        flops=int(P * HW * (2 * (Kh + Kw) - 2)),
        transcendentals=0,
        bytes_accessed=int(2 * P_pad * HW * itemsize),
    )

    out_flat = pl.pallas_call(
        kernel,
        out_shape=jax.ShapeDtypeStruct((P_pad, HW), x.dtype),
        grid=grid,
        in_specs=[pl.BlockSpec((tile_P, HW), lambda p: (p, 0))],
        out_specs=pl.BlockSpec((tile_P, HW), lambda p: (p, 0)),
        compiler_params=pltpu.CompilerParams(
            dimension_semantics=("parallel",),
            vmem_limit_bytes=48 << 20),
        cost_estimate=cost,
    )(x_flat)

    # ---- unpack: reshape + slice only (no transpose) ------------------------
    out = out_flat[:P].reshape(P, H, W)[:, :Ho, :Wo]
    return out.reshape(N, C, Ho, Wo)


def _reference(x, kernel2d):
    """Pure-JAX reference: depthwise valid conv2d (groups=channels)."""
    _, C, _, _ = x.shape
    K0, K1 = kernel2d.shape
    w = jnp.broadcast_to(kernel2d[None, None, :, :], (C, 1, K0, K1))
    return jax.lax.conv_general_dilated(
        x, w, window_strides=(1, 1), padding="VALID",
        dimension_numbers=("NCHW", "OIHW", "NCHW"),
        feature_group_count=C)


if __name__ == "__main__":
    # Module config: channels=4, kernel_size=5, sigma=2.0, dim=2
    channels, kernel_size, sigma = 4, 5, 2.0
    N, H, W = 2, 16, 16

    key = jax.random.PRNGKey(0)
    x = jax.random.normal(key, (N, channels, H, W), dtype=jnp.float32)

    out = gaussian_smoothing(x, kernel_size, sigma)
    out = jax.block_until_ready(out)

    gh, gw = _gaussian_1d_factors(kernel_size, sigma, dim=2)
    kernel2d = jnp.asarray(np.outer(gh, gw), dtype=jnp.float32)  # == module weight
    ref = _reference(x, kernel2d)

    Ho, Wo = H - kernel_size + 1, W - kernel_size + 1
    assert out.shape == ref.shape == (N, channels, Ho, Wo), (out.shape, ref.shape)
    err = float(jnp.max(jnp.abs(out - ref)))
    assert jnp.allclose(out, ref, atol=1e-5, rtol=1e-5), (
        f"mismatch vs reference conv, max err {err}")

    print("KERNEL_OK")
</pallas_src>

<mosaic_0001>
module attributes {stable_mosaic.version = 11 : i64} {
  func.func @kernel(%arg0: i32, %arg1: memref<8x256xf32, #tpu.memory_space<vmem>>, %arg2: memref<8x256xf32, #tpu.memory_space<vmem>>) attributes {dimension_semantics = [#tpu.dimension_semantics<parallel>], iteration_bounds = array<i64: 1>, scalar_prefetch = 0 : i64, scratch_operands = 0 : i64, tpu.core_type = #tpu.core_type<tc>, window_params = [{transform_indices = @transform_0, window_bounds = array<i64: 8, 256>}, {transform_indices = @transform_1, window_bounds = array<i64: 8, 256>}]} {
    %c0 = arith.constant 0 : index
    %c0_0 = arith.constant 0 : index
    %0 = vector.load %arg1[%c0, %c0_0] : memref<8x256xf32, #tpu.memory_space<vmem>>, vector<8x256xf32>
    %c192_i32 = arith.constant 192 : i32
    %1 = tpu.dynamic_rotate %0 by %c192_i32 dim 1 : vector<8x256xf32>, i32 -> vector<8x256xf32>
    %2 = arith.addf %0, %1 : vector<8x256xf32>
    %cst = arith.constant 0.175546825 : f32
    %3 = vector.broadcast %cst : f32 to vector<8x256xf32>
    %4 = arith.mulf %3, %2 : vector<8x256xf32>
    %c240_i32 = arith.constant 240 : i32
    %5 = tpu.dynamic_rotate %0 by %c240_i32 dim 1 : vector<8x256xf32>, i32 -> vector<8x256xf32>
    %c208_i32 = arith.constant 208 : i32
    %6 = tpu.dynamic_rotate %0 by %c208_i32 dim 1 : vector<8x256xf32>, i32 -> vector<8x256xf32>
    %7 = arith.addf %5, %6 : vector<8x256xf32>
    %cst_1 = arith.constant 0.211749882 : f32
    %8 = vector.broadcast %cst_1 : f32 to vector<8x256xf32>
    %9 = arith.mulf %8, %7 : vector<8x256xf32>
    %10 = arith.addf %4, %9 : vector<8x256xf32>
    %c224_i32 = arith.constant 224 : i32
    %11 = tpu.dynamic_rotate %0 by %c224_i32 dim 1 : vector<8x256xf32>, i32 -> vector<8x256xf32>
    %cst_2 = arith.constant 0.225406587 : f32
    %12 = vector.broadcast %cst_2 : f32 to vector<8x256xf32>
    %13 = arith.mulf %12, %11 : vector<8x256xf32>
    %14 = arith.addf %10, %13 : vector<8x256xf32>
    %c252_i32 = arith.constant 252 : i32
    %15 = tpu.dynamic_rotate %14 by %c252_i32 dim 1 : vector<8x256xf32>, i32 -> vector<8x256xf32>
    %16 = arith.addf %14, %15 : vector<8x256xf32>
    %cst_3 = arith.constant 0.175546825 : f32
    %17 = vector.broadcast %cst_3 : f32 to vector<8x256xf32>
    %18 = arith.mulf %17, %16 : vector<8x256xf32>
    %c255_i32 = arith.constant 255 : i32
    %19 = tpu.dynamic_rotate %14 by %c255_i32 dim 1 : vector<8x256xf32>, i32 -> vector<8x256xf32>
    %c253_i32 = arith.constant 253 : i32
    %20 = tpu.dynamic_rotate %14 by %c253_i32 dim 1 : vector<8x256xf32>, i32 -> vector<8x256xf32>
    %21 = arith.addf %19, %20 : vector<8x256xf32>
    %cst_4 = arith.constant 0.211749882 : f32
    %22 = vector.broadcast %cst_4 : f32 to vector<8x256xf32>
    %23 = arith.mulf %22, %21 : vector<8x256xf32>
    %24 = arith.addf %18, %23 : vector<8x256xf32>
    %c254_i32 = arith.constant 254 : i32
    %25 = tpu.dynamic_rotate %14 by %c254_i32 dim 1 : vector<8x256xf32>, i32 -> vector<8x256xf32>
    %cst_5 = arith.constant 0.225406587 : f32
    %26 = vector.broadcast %cst_5 : f32 to vector<8x256xf32>
    %27 = arith.mulf %26, %25 : vector<8x256xf32>
    %28 = arith.addf %24, %27 : vector<8x256xf32>
    %c0_6 = arith.constant 0 : index
    %c0_7 = arith.constant 0 : index
    %29 = vector.load %arg2[%c0_6, %c0_7] : memref<8x256xf32, #tpu.memory_space<vmem>>, vector<8x256xf32>
    tpu.vector_store %arg2[%c0_6, %c0_7], %28 {strides = array<i32>} : memref<8x256xf32, #tpu.memory_space<vmem>>, vector<8x256xf32>,
    return
  }
  func.func @transform_0(%arg0: i32) -> (i32, i32) {
    %c0_i32 = arith.constant 0 : i32
    %c0_i32_0 = arith.constant 0 : i32
    return %arg0, %c0_i32 : i32, i32
  }
  func.func @transform_1(%arg0: i32) -> (i32, i32) {
    %c0_i32 = arith.constant 0 : i32
    %c0_i32_0 = arith.constant 0 : i32
    return %arg0, %c0_i32 : i32, i32
  }
}

</mosaic_0001>

<bundles_post_ra>
// kernel: tpu_custom_call.1
= control target key start
LH: loop header
LB: loop body
LE: loop exit
PB: predicated region body
PF: predicated region fallthrough
CT: control target
= control target key end

     0   :  { %6 = vsyncpa [#allocation3], 0  ;;  %s216_s0 = inlined_call_operand.hbm [shape: f32[8,256], index: 0, kind: input, shape index: {}]   ;;  %s217_s1 = inlined_call_operand.hbm [shape: f32[8,256], index: 1, kind: output, shape index: {}]  }
   0x1   :  { %7 = vsyncpa [#allocation4], 0  ;;  %s180_s6 = smov [#allocation2]  }
   0x2   :  { %s14_s7 = sshll.u32 %s180_s6, 4  ;;  %s15_s7 = int_to_ptr.vmem [resolvable:$true] %s14_s7 }
   0x3   :  { %s144_s8 = scalar_lea.vmem %s15_s7, 256  ;;  %p149_p1 = scmp.lt.s32.totalorder %s15_s7, %s15_s7 }
   0x4   :  { %p145_p0 = scmp.ne.s32.totalorder %s15_s7, %s144_s8  ;;  %p150_p2 = scmp.lt.s32.totalorder %s144_s8, %s144_s8 }
   0x6   :  { %p151_p3 = por %p150_p2, %p149_p1 }
   0x8   :  { %p152_p4 = pnand %p151_p3, %p145_p0 }
   0xa   :  { %155 = shalt.err (!%p152_p4)
}
   0xb   :  { %17 = dma.hbm_to_vmem [thread:$0]  %s216_s0, 256, %s15_s7, [#allocation3]  }
   0xc   :  { %176 = dma.done.wait [#allocation3], 256  }
   0xd   :  { %177 = vsyncadd [#allocation3], 4294967040  ;;  %v21_v0 = vld [vmem:[#allocation2] sm:$0xff]  ;;  %s181_s11 = smov 112   ;;  %s182_s12 = smov 64   ;;  %v22_v1 = vld [vmem:[#allocation2 + $0x8] sm:$0xff]  ;;  %v27_v2 = vlaneseq }
   0xe   :  { %36 = vrot.lane.b32.xlu1 %v21_v0, %s181_s11  ;;  %23 = vrot.lane.b32.xlu0 %v21_v0, %s182_s12  ;;  %s183_s13 = smov 80   ;;  %s184_s14 = smov 96  }
   0xf   :  { %v203_v3 = vand.u32 127, %v27_v2  ;;  %s185_s0 = smov 124   ;;  %s186_s15 = smov 127  }
  0x10   :  { %s187_s16 = smov 125   ;;  %s188_s17 = smov 126  }
  0x11   :  { %vm29_vm0 = vcmp.lt.s32.totalorder %v203_v3, 64  ;;  %vm40_vm1 = vcmp.lt.s32.totalorder %v203_v3, 112  ;;  %vm47_vm2 = vcmp.lt.s32.totalorder %v203_v3, 80  ;;  %vm60_vm3 = vcmp.lt.s32.totalorder %v203_v3, 96  ;;  %s189_s18 = smov [#allocation5]  }
  0x12   :  { %38 = vrot.lane.b32.xlu1 %v22_v1, %s181_s11  ;;  %25 = vrot.lane.b32.xlu0 %v22_v1, %s182_s12  ;;  %vm71_vm4 = vcmp.lt.s32.totalorder %v203_v3, 124  ;;  %vm82_vm5 = vcmp.lt.s32.totalorder %v203_v3, 127  ;;  %vm89_vm6 = vcmp.lt.s32.totalorder %v203_v3, 125  ;;  %vm102_vm7 = vcmp.lt.s32.totalorder %v203_v3, 126  ;;  %s117_s19 = sshll.u32 %s189_s18, 4  ;;  %s118_s19 = int_to_ptr.vmem [resolvable:$true] %s117_s19 }
  0x13   :  { %s156_s20 = scalar_lea.vmem %s118_s19, 256  ;;  %p161_p6 = scmp.lt.s32.totalorder %s118_s19, %s118_s19 }
  0x14   :  { %p157_p5 = scmp.ne.s32.totalorder %s118_s19, %s156_s20  ;;  %p162_p7 = scmp.lt.s32.totalorder %s156_s20, %s156_s20 }
  0x16   :  { %45 = vrot.lane.b32.xlu1 %v22_v1, %s183_s13  ;;  %43 = vrot.lane.b32.xlu0 %v21_v0, %s183_s13  ;;  %p163_p8 = por %p162_p7, %p161_p6 }
  0x18   :  { %p164_p9 = pnand %p163_p8, %p157_p5 }
  0x1a   :  { %58 = vrot.lane.b32.xlu1 %v22_v1, %s184_s14  ;;  %56 = vrot.lane.b32.xlu0 %v21_v0, %s184_s14 }
  0x80   :  { %v37_v4 = vpop.permute.xlu1 %36  ;;  %v24_v5 = vpop.permute.xlu0 %23 }
  0x84   :  { %v39_v6 = vpop.permute.xlu1 %38  ;;  %v26_v7 = vpop.permute.xlu0 %25 }
  0x85   :  { %v30_v8 = vsel %vm29_vm0, %v24_v5, %v26_v7  ;;  %v31_v9 = vsel %vm29_vm0, %v26_v7, %v24_v5  ;;  %v41_v14 = vsel %vm40_vm1, %v37_v4, %v39_v6  ;;  %v42_v15 = vsel %vm40_vm1, %v39_v6, %v37_v4 }
  0x86   :  { %v32_v10 = vadd.f32 %v30_v8, %v21_v0  ;;  %v33_v11 = vadd.f32 %v31_v9, %v22_v1 }
  0x88   :  { %v46_v12 = vpop.permute.xlu1 %45  ;;  %v44_v13 = vpop.permute.xlu0 %43  ;;  %v34_v20 = vmul.f32 0.17554682, %v32_v10  ;;  %v35_v21 = vmul.f32 0.17554682, %v33_v11 }
  0x89   :  { %v48_v16 = vsel %vm47_vm2, %v44_v13, %v46_v12  ;;  %v49_v17 = vsel %vm47_vm2, %v46_v12, %v44_v13 }
  0x8a   :  { %v50_v18 = vadd.f32 %v48_v16, %v41_v14  ;;  %v51_v19 = vadd.f32 %v49_v17, %v42_v15 }
  0x8c   :  { %v52_v22 = vmul.f32 0.21174988, %v50_v18  ;;  %v53_v23 = vmul.f32 0.21174988, %v51_v19  ;;  %v59_v24 = vpop.permute.xlu1 %58  ;;  %v57_v25 = vpop.permute.xlu0 %56 }
  0x8d   :  { %v61_v26 = vsel %vm60_vm3, %v57_v25, %v59_v24  ;;  %v62_v27 = vsel %vm60_vm3, %v59_v24, %v57_v25 }
  0x8e   :  { %v54_v28 = vadd.f32 %v52_v22, %v34_v20  ;;  %v55_v29 = vadd.f32 %v53_v23, %v35_v21  ;;  %v63_v30 = vmul.f32 0.22540659, %v61_v26  ;;  %v64_v31 = vmul.f32 0.22540659, %v62_v27 }
  0x90   :  { %v65_v32 = vadd.f32 %v63_v30, %v54_v28  ;;  %v66_v33 = vadd.f32 %v64_v31, %v55_v29 }
  0x92   :  { %69 = vrot.lane.b32.xlu1 %v66_v33, %s185_s0  ;;  %67 = vrot.lane.b32.xlu0 %v65_v32, %s185_s0 }
  0x96   :  { %80 = vrot.lane.b32.xlu1 %v66_v33, %s186_s15  ;;  %78 = vrot.lane.b32.xlu0 %v65_v32, %s186_s15 }
  0x9a   :  { %87 = vrot.lane.b32.xlu1 %v66_v33, %s187_s16  ;;  %85 = vrot.lane.b32.xlu0 %v65_v32, %s187_s16 }
  0x9e   :  { %100 = vrot.lane.b32.xlu1 %v66_v33, %s188_s17  ;;  %98 = vrot.lane.b32.xlu0 %v65_v32, %s188_s17 }
 0x104   :  { %v70_v34 = vpop.permute.xlu1 %69  ;;  %v68_v35 = vpop.permute.xlu0 %67 }
 0x105   :  { %v72_v36 = vsel %vm71_vm4, %v68_v35, %v70_v34  ;;  %v73_v39 = vsel %vm71_vm4, %v70_v34, %v68_v35 }
 0x106   :  { %v74_v40 = vadd.f32 %v72_v36, %v65_v32  ;;  %v75_v41 = vadd.f32 %v73_v39, %v66_v33 }
 0x108   :  { %v81_v37 = vpop.permute.xlu1 %80  ;;  %v79_v38 = vpop.permute.xlu0 %78  ;;  %v76_v50 = vmul.f32 0.17554682, %v74_v40  ;;  %v77_v51 = vmul.f32 0.17554682, %v75_v41 }
 0x109   :  { %v83_v44 = vsel %vm82_vm5, %v79_v38, %v81_v37  ;;  %v84_v45 = vsel %vm82_vm5, %v81_v37, %v79_v38 }
 0x10c   :  { %v88_v42 = vpop.permute.xlu1 %87  ;;  %v86_v43 = vpop.permute.xlu0 %85 }
 0x10d   :  { %v90_v46 = vsel %vm89_vm6, %v86_v43, %v88_v42  ;;  %v91_v47 = vsel %vm89_vm6, %v88_v42, %v86_v43 }
 0x10e   :  { %v92_v48 = vadd.f32 %v90_v46, %v83_v44  ;;  %v93_v49 = vadd.f32 %v91_v47, %v84_v45 }
 0x110   :  { %v94_v52 = vmul.f32 0.21174988, %v92_v48  ;;  %v95_v53 = vmul.f32 0.21174988, %v93_v49  ;;  %v101_v54 = vpop.permute.xlu1 %100  ;;  %v99_v55 = vpop.permute.xlu0 %98 }
 0x111   :  { %v103_v56 = vsel %vm102_vm7, %v99_v55, %v101_v54  ;;  %v104_v57 = vsel %vm102_vm7, %v101_v54, %v99_v55 }
 0x112   :  { %v96_v58 = vadd.f32 %v94_v52, %v76_v50  ;;  %v97_v59 = vadd.f32 %v95_v53, %v77_v51  ;;  %v105_v60 = vmul.f32 0.22540659, %v103_v56  ;;  %v106_v61 = vmul.f32 0.22540659, %v104_v57 }
 0x114   :  { %v107_v62 = vadd.f32 %v105_v60, %v96_v58  ;;  %v108_v63 = vadd.f32 %v106_v61, %v97_v59 }
 0x116   :  { %109 = vst [vmem:[#allocation5] sm:$0xff] %v107_v62  ;;  %110 = vst [vmem:[#allocation5 + $0x8] sm:$0xff] %v108_v63 }
 0x117   :  { %167 = shalt.err (!%p164_p9)
}
 0x118   :  { %120 = dma.vmem_to_hbm [thread:$0]  %s118_s19, 256, %s217_s1, [#allocation4]  }
 0x119   :  { %178 = dma.done.wait [#allocation4], 256  }
 0x11a   :  { %179 = vsyncadd [#allocation4], 4294967040 }
 0x11b   :  { %124 = vsyncpa [#allocation3], 1 }
 0x11c   :  { %125 = vsyncpa [#allocation4], 1 }

</bundles_post_ra>
